<compile_context>
chip_gen: v6e
topology: v6e:2x2x1
jax: 0.10.0
libtpu: 0.0.40
codegen_flags: <defaults>
</compile_context>

<pallas_src>
import functools

import jax
import jax.numpy as jnp
from jax.experimental import pallas as pl
from jax.experimental.pallas import tpu as pltpu


# ---------------------------------------------------------------------------
# Fused GCN stack + station mean
# ---------------------------------------------------------------------------
def gcn_stack_mean_kernel(num_layers, ahat_ref, x_ref, *rest):
    # rest = (w0, b0, w1, b1, ..., out_ref)
    o_ref = rest[-1]
    wb = rest[:-1]

    h = x_ref[...]                                    # (TG, S, F) f32
    tg, S, _ = h.shape

    a = ahat_ref[...]                                 # (S, S) shared or (TG, S, S)
    if a.ndim == 2:                                   # hoisted once, not per layer
        a = jnp.broadcast_to(a[None], (tg, S, S))

    for l in range(num_layers):
        w = wb[2 * l][...]                            # (Fin, H) bf16
        b = wb[2 * l + 1][...]                        # (1, H)  f32
        # aggregate-before-transform: (A_hat @ X) @ W
        agg = jnp.einsum('gij,gjf->gif', a, h,
                         preferred_element_type=jnp.float32)          # (TG, S, Fin)
        fin, hdim = w.shape
        # single flat 2-D matmul -> real M dimension for the MXU
        z = jnp.dot(agg.reshape(tg * S, fin).astype(jnp.bfloat16), w,
                    preferred_element_type=jnp.float32)
        h = jnp.maximum(z.reshape(tg, S, hdim) + b[None], 0.0)        # relu (dropout=id)

    # station mean (dim=2 of the original (B, W, S, H) tensor)
    o_ref[...] = jnp.mean(h, axis=1)


def _pick_group_block(g, cap=256):
    if g <= cap:
        return g
    for tg in range(cap, 7, -1):                      # multiple-of-8 divisor if any
        if g % tg == 0 and tg % 8 == 0:
            return tg
    return cap - (cap % 8)                            # partial last tile via pl.cdiv


def gcn_stack_mean(ahat, x_gsf, gcn_params):
    """ahat: (S, S) shared or (G, S, S); x_gsf: (G, S, F) -> (G, H) station means."""
    G, S, F = x_gsf.shape
    H = gcn_params[-1][0].shape[1]
    TG = _pick_group_block(G)

    in_specs = []
    args = []
    if ahat.ndim == 2:
        in_specs.append(pl.BlockSpec((S, S), lambda i: (0, 0)))
    else:
        in_specs.append(pl.BlockSpec((TG, S, S), lambda i: (i, 0, 0)))
    args.append(ahat)
    in_specs.append(pl.BlockSpec((TG, S, F), lambda i: (i, 0, 0)))
    args.append(x_gsf)
    for (w, b) in gcn_params:
        in_specs.append(pl.BlockSpec(w.shape, lambda i: (0, 0)))
        in_specs.append(pl.BlockSpec(b.shape, lambda i: (0, 0)))
        args += [w, b]

    return pl.pallas_call(
        functools.partial(gcn_stack_mean_kernel, len(gcn_params)),
        grid=(pl.cdiv(G, TG),),
        in_specs=in_specs,
        out_specs=pl.BlockSpec((TG, H), lambda i: (i, 0)),
        out_shape=jax.ShapeDtypeStruct((G, H), jnp.float32),
        compiler_params=pltpu.CompilerParams(dimension_semantics=("parallel",)),
    )(*args)


# ---------------------------------------------------------------------------
# Fused transformer-encoder stack (post-norm, relu) + last-step Linear
# ---------------------------------------------------------------------------
_LAYER_KEYS = ("wqkv", "bqkv", "wo", "bo", "g1", "be1",
               "w1", "b1", "w2", "b2", "g2", "be2")


def _layernorm(x, g, b, eps=1e-5):
    mu = jnp.mean(x, axis=-1, keepdims=True)
    xc = x - mu
    var = jnp.mean(xc * xc, axis=-1, keepdims=True)
    return xc * jax.lax.rsqrt(var + eps) * g + b


def encoder_fc_kernel(num_layers, num_heads, Wn, x_ref, *rest):
    # rest = (12 params per layer) * num_layers + (fc_w, fc_b) + (out_ref,)
    out_ref = rest[-1]
    fcw_ref, fcb_ref = rest[-3], rest[-2]
    lw = rest[:-3]

    x = x_ref[0]                                      # (Wn, D) f32, one batch
    D = x.shape[-1]
    dh = D // num_heads
    scale = 1.0 / (dh ** 0.5)

    for l in range(num_layers):
        (wqkv, bqkv, wo, bo, g1, be1,
         w1, b1, w2, b2, g2, be2) = lw[12 * l:12 * (l + 1)]

        # position-wise QKV projection: one (Wn, D) @ (D, 3D) matmul
        qkv = jnp.dot(x.astype(jnp.bfloat16), wqkv[...],
                      preferred_element_type=jnp.float32) + bqkv[...]   # (Wn, 3D)

        # head-batched attention (no per-head Python loop)
        q = jnp.transpose(qkv[:, :D].reshape(Wn, num_heads, dh), (1, 0, 2))
        k = jnp.transpose(qkv[:, D:2 * D].reshape(Wn, num_heads, dh), (1, 0, 2))
        v = jnp.transpose(qkv[:, 2 * D:].reshape(Wn, num_heads, dh), (1, 0, 2))
        s = jnp.einsum('hqd,hkd->hqk', q, k,
                       preferred_element_type=jnp.float32) * scale      # (h, Wn, Wn)
        s = s - jnp.max(s, axis=-1, keepdims=True)
        p = jnp.exp(s)
        p = p / jnp.sum(p, axis=-1, keepdims=True)                      # exact softmax
        o = jnp.einsum('hqk,hkd->hqd', p, v,
                       preferred_element_type=jnp.float32)              # (h, Wn, dh)
        o = jnp.transpose(o, (1, 0, 2)).reshape(Wn, D)
        attn = jnp.dot(o.astype(jnp.bfloat16), wo[...],
                       preferred_element_type=jnp.float32) + bo[...]    # one out-proj

        x1 = _layernorm(x + attn, g1[...], be1[...])                    # norm1(x + attn)

        hid = jnp.maximum(
            jnp.dot(x1.astype(jnp.bfloat16), w1[...],
                    preferred_element_type=jnp.float32) + b1[...], 0.0)
        # TODO(synk): K-tile this FFN (dff axis) with an f32 accumulator when
        #             Wn/dff grow past toy sizes (v7x 64 MiB VMEM budget).
        ff = jnp.dot(hid.astype(jnp.bfloat16), w2[...],
                     preferred_element_type=jnp.float32) + b2[...]
        x = _layernorm(x1 + ff, g2[...], be2[...])                      # norm2(x + ff)

    # fused final Linear on the last-timestep row only (lane-padded width)
    last = x[Wn - 1:Wn, :]                                              # (1, D)
    out_ref[...] = (jnp.dot(last.astype(jnp.bfloat16), fcw_ref[...],
                            preferred_element_type=jnp.float32)
                    + fcb_ref[...])[None]                               # (1, 1, Tp)


def transformer_encoder_fc(h_bwd, layers, num_heads, fc_w_pad, fc_b_pad):
    B, Wn, D = h_bwd.shape
    Tp = fc_w_pad.shape[1]
    inv = lambda b: (0, 0)                            # grid-invariant 2-D weights

    in_specs = [pl.BlockSpec((1, Wn, D), lambda b: (b, 0, 0))]
    args = [h_bwd]
    for lp in layers:
        for kname in _LAYER_KEYS:
            in_specs.append(pl.BlockSpec(lp[kname].shape, inv))
            args.append(lp[kname])
    in_specs += [pl.BlockSpec(fc_w_pad.shape, inv), pl.BlockSpec(fc_b_pad.shape, inv)]
    args += [fc_w_pad, fc_b_pad]

    out = pl.pallas_call(
        functools.partial(encoder_fc_kernel, len(layers), num_heads, Wn),
        grid=(B,),
        in_specs=in_specs,
        out_specs=pl.BlockSpec((1, 1, Tp), lambda b: (b, 0, 0)),
        out_shape=jax.ShapeDtypeStruct((B, 1, Tp), jnp.float32),
        compiler_params=pltpu.CompilerParams(dimension_semantics=("parallel",)),
    )(*args)
    return out.reshape(B, Tp)


# ---------------------------------------------------------------------------
# Graph normalization (precomputed once), parameters, forward
# ---------------------------------------------------------------------------
def gcn_norm_blocks(edge_index, num_groups, num_stations):
    # PyG GCNConv default normalization restricted to the block-diagonal graph:
    # per (batch, window) group, D^{-1/2} (A + I) D^{-1/2} with edge_weight = 1.
    # TODO(synk): edges crossing (batch, window) groups are not supported by
    #             this block-diagonal fast path.
    src, dst = edge_index[0], edge_index[1]
    g = src // num_stations
    A = jnp.zeros((num_groups, num_stations, num_stations), jnp.float32)
    A = A.at[g, dst % num_stations, src % num_stations].add(1.0)
    A = A + jnp.eye(num_stations, dtype=jnp.float32)[None]
    deg = jnp.sum(A, axis=2)
    dinv = jax.lax.rsqrt(deg)
    return dinv[:, :, None] * A * dinv[:, None, :]


def dedup_graph_blocks(blocks):
    # If every (batch, window) group carries the same station graph (the usual
    # case), keep one shared (S, S) block -> G x less adjacency HBM traffic.
    if bool(jnp.all(blocks == blocks[0:1])):
        return blocks[0]
    return blocks


def build_ring_edges(B, Wn, S):
    # Bidirectional ring over stations within each (batch, window) group on the
    # flattened B*Wn*S node index space (as the PyTorch forward expects).
    src, dst = [], []
    for grp in range(B * Wn):
        base = grp * S
        for i in range(S):
            j = (i + 1) % S
            src += [base + i, base + j]
            dst += [base + j, base + i]
    return jnp.array([src, dst], dtype=jnp.int32)


def init_params(key, num_features, hidden_dim, num_layers, num_heads,
                num_targets, dff=2048):
    keys = iter(jax.random.split(key, 64))

    def w(shape, dtype=jnp.bfloat16, scale=0.05):
        return (scale * jax.random.normal(next(keys), shape, jnp.float32)).astype(dtype)

    gcn = []
    fin = num_features
    for _ in range(num_layers):
        gcn.append((w((fin, hidden_dim)), w((1, hidden_dim), jnp.float32)))
        fin = hidden_dim

    D = hidden_dim
    layers = []
    for _ in range(num_layers):
        layers.append(dict(
            wqkv=w((D, 3 * D)), bqkv=w((1, 3 * D), jnp.float32),
            wo=w((D, D)), bo=w((1, D), jnp.float32),
            g1=jnp.ones((1, D), jnp.float32), be1=jnp.zeros((1, D), jnp.float32),
            w1=w((D, dff)), b1=w((1, dff), jnp.float32),
            w2=w((dff, D)), b2=w((1, D), jnp.float32),
            g2=jnp.ones((1, D), jnp.float32), be2=jnp.zeros((1, D), jnp.float32),
        ))
    return dict(gcn=gcn, layers=layers,
                fc_w=w((D, num_targets)), fc_b=w((1, num_targets), jnp.float32))


def st_tgn_forward(params, num_heads, x, ahat, edge_attr=None, mask=None):
    # edge_attr / mask accepted to mirror the PyTorch signature; unused here.
    # TODO(synk): attention mask != None is not implemented (module uses None).
    B, Wn, S, F = x.shape
    G = B * Wn

    # GCN stack -> relu -> (eval dropout) -> station mean, all in one kernel.
    h = gcn_stack_mean(ahat, x.reshape(G, S, F).astype(jnp.float32),
                       params["gcn"])                        # (B*Wn, H)
    D = h.shape[1]

    # final Linear padded to a lane-dense (multiple-of-128) output width
    fc_w, fc_b = params["fc_w"], params["fc_b"]
    T = fc_w.shape[1]
    Tp = ((T + 127) // 128) * 128
    fc_w_pad = jnp.zeros((D, Tp), jnp.bfloat16).at[:, :T].set(fc_w.astype(jnp.bfloat16))
    fc_b_pad = jnp.zeros((1, Tp), jnp.float32).at[:, :T].set(fc_b.astype(jnp.float32))

    out = transformer_encoder_fc(h.reshape(B, Wn, D), params["layers"],
                                 num_heads, fc_w_pad, fc_b_pad)          # (B, Tp)
    return out[:, :T]


# ---------------------------------------------------------------------------
if __name__ == "__main__":
    B, Wn, S, F = 2, 8, 4, 4                  # batch, window, stations, features
    hidden_dim, num_layers, num_heads, num_targets = 32, 2, 4, 1

    key = jax.random.PRNGKey(0)
    kx, kp = jax.random.split(key, 2)

    x = jax.random.normal(kx, (B, Wn, S, F), jnp.float32)
    edge_index = build_ring_edges(B, Wn, S)
    edge_attr = jnp.ones((edge_index.shape[1], 1), jnp.float32)   # unused, like the module

    # Graph is fixed -> normalized adjacency blocks precomputed once and
    # deduplicated to a single shared (S, S) block (every group is identical).
    ahat = dedup_graph_blocks(gcn_norm_blocks(edge_index, B * Wn, S))

    params = init_params(kp, F, hidden_dim, num_layers, num_heads, num_targets)

    out = st_tgn_forward(params, num_heads, x, ahat, edge_attr, mask=None)
    out = jax.block_until_ready(out)

    assert out.shape == (B, num_targets) and out.dtype == jnp.float32
    print("KERNEL_OK")
</pallas_src>

<mosaic_0001>
module attributes {stable_mosaic.version = 11 : i64} {
  func.func @gcn_stack_mean_kernel(%arg0: i32, %arg1: memref<4x4xf32, #tpu.memory_space<vmem>>, %arg2: memref<16x4x4xf32, #tpu.memory_space<vmem>>, %arg3: memref<4x32xbf16, #tpu.memory_space<vmem>>, %arg4: memref<1x32xf32, #tpu.memory_space<vmem>>, %arg5: memref<32x32xbf16, #tpu.memory_space<vmem>>, %arg6: memref<1x32xf32, #tpu.memory_space<vmem>>, %arg7: memref<16x32xf32, #tpu.memory_space<vmem>>) attributes {dimension_semantics = [#tpu.dimension_semantics<parallel>], iteration_bounds = array<i64: 1>, scalar_prefetch = 0 : i64, scratch_operands = 0 : i64, tpu.core_type = #tpu.core_type<tc>, window_params = [{pipeline_mode = #tpu.pipeline_mode<synchronous>, transform_indices = @transform_0, window_bounds = array<i64: 4, 4>}, {transform_indices = @transform_1, window_bounds = array<i64: 16, 4, 4>}, {pipeline_mode = #tpu.pipeline_mode<synchronous>, transform_indices = @transform_2, window_bounds = array<i64: 4, 32>}, {pipeline_mode = #tpu.pipeline_mode<synchronous>, transform_indices = @transform_3, window_bounds = array<i64: 1, 32>}, {pipeline_mode = #tpu.pipeline_mode<synchronous>, transform_indices = @transform_4, window_bounds = array<i64: 32, 32>}, {pipeline_mode = #tpu.pipeline_mode<synchronous>, transform_indices = @transform_5, window_bounds = array<i64: 1, 32>}, {transform_indices = @transform_6, window_bounds = array<i64: 16, 32>}]} {
    %c0 = arith.constant 0 : index
    %c0_0 = arith.constant 0 : index
    %c0_1 = arith.constant 0 : index
    %0 = vector.load %arg2[%c0, %c0_0, %c0_1] : memref<16x4x4xf32, #tpu.memory_space<vmem>>, vector<16x4x4xf32>
    %c0_2 = arith.constant 0 : index
    %c0_3 = arith.constant 0 : index
    %1 = vector.load %arg1[%c0_2, %c0_3] : memref<4x4xf32, #tpu.memory_space<vmem>>, vector<4x4xf32>
    %2 = vector.shape_cast %1 : vector<4x4xf32> to vector<1x4x4xf32>
    %3 = vector.shape_cast %2 : vector<1x4x4xf32> to vector<1x4x4xf32>
    %4 = vector.broadcast %3 : vector<1x4x4xf32> to vector<16x4x4xf32>
    %c0_4 = arith.constant 0 : index
    %c0_5 = arith.constant 0 : index
    %5 = vector.load %arg3[%c0_4, %c0_5] : memref<4x32xbf16, #tpu.memory_space<vmem>>, vector<4x32xbf16>
    %c0_6 = arith.constant 0 : index
    %c0_7 = arith.constant 0 : index
    %6 = vector.load %arg4[%c0_6, %c0_7] : memref<1x32xf32, #tpu.memory_space<vmem>>, vector<1x32xf32>
    "tpu.trace_start"() <{level = 10 : i32, message = "gij,gjf->gif"}> : () -> ()
    %cst = arith.constant dense<0.000000e+00> : vector<16x4x4xf32>
    %7 = tpu.matmul %4, %0, %cst {dimension_numbers = #tpu.dot_dimension_numbers<[2], [1], [1], [2], [0, 0, 0, 1, 1, 2], [0], [0]>} : vector<16x4x4xf32>, vector<16x4x4xf32>, vector<16x4x4xf32> -> vector<16x4x4xf32>
    "tpu.trace_stop"() : () -> ()
    %8 = vector.shape_cast %7 : vector<16x4x4xf32> to vector<64x4xf32>
    %9 = arith.truncf %8 : vector<64x4xf32> to vector<64x4xbf16>
    %cst_8 = arith.constant dense<0.000000e+00> : vector<64x32xf32>
    %10 = tpu.matmul %9, %5, %cst_8 {dimension_numbers = #tpu.dot_dimension_numbers<[1], [0], [0], [1], [0, 0, 1, 1], [], []>} : vector<64x4xbf16>, vector<4x32xbf16>, vector<64x32xf32> -> vector<64x32xf32>
    %11 = vector.shape_cast %10 : vector<64x32xf32> to vector<16x4x32xf32>
    %12 = vector.shape_cast %6 : vector<1x32xf32> to vector<1x1x32xf32>
    %13 = vector.broadcast %12 : vector<1x1x32xf32> to vector<16x4x32xf32>
    %14 = arith.addf %11, %13 : vector<16x4x32xf32>
    %cst_9 = arith.constant 0.000000e+00 : f32
    %15 = vector.broadcast %cst_9 : f32 to vector<16x4x32xf32>
    %16 = arith.maximumf %14, %15 : vector<16x4x32xf32>
    %c0_10 = arith.constant 0 : index
    %c0_11 = arith.constant 0 : index
    %17 = vector.load %arg5[%c0_10, %c0_11] : memref<32x32xbf16, #tpu.memory_space<vmem>>, vector<32x32xbf16>
    %c0_12 = arith.constant 0 : index
    %c0_13 = arith.constant 0 : index
    %18 = vector.load %arg6[%c0_12, %c0_13] : memref<1x32xf32, #tpu.memory_space<vmem>>, vector<1x32xf32>
    "tpu.trace_start"() <{level = 10 : i32, message = "gij,gjf->gif"}> : () -> ()
    %cst_14 = arith.constant dense<0.000000e+00> : vector<16x4x32xf32>
    %19 = tpu.matmul %4, %16, %cst_14 {dimension_numbers = #tpu.dot_dimension_numbers<[2], [1], [1], [2], [0, 0, 0, 1, 1, 2], [0], [0]>} : vector<16x4x4xf32>, vector<16x4x32xf32>, vector<16x4x32xf32> -> vector<16x4x32xf32>
    "tpu.trace_stop"() : () -> ()
    %20 = vector.shape_cast %19 : vector<16x4x32xf32> to vector<64x32xf32>
    %21 = arith.truncf %20 : vector<64x32xf32> to vector<64x32xbf16>
    %cst_15 = arith.constant dense<0.000000e+00> : vector<64x32xf32>
    %22 = tpu.matmul %21, %17, %cst_15 {dimension_numbers = #tpu.dot_dimension_numbers<[1], [0], [0], [1], [0, 0, 1, 1], [], []>} : vector<64x32xbf16>, vector<32x32xbf16>, vector<64x32xf32> -> vector<64x32xf32>
    %23 = vector.shape_cast %22 : vector<64x32xf32> to vector<16x4x32xf32>
    %24 = vector.shape_cast %18 : vector<1x32xf32> to vector<1x1x32xf32>
    %25 = vector.broadcast %24 : vector<1x1x32xf32> to vector<16x4x32xf32>
    %26 = arith.addf %23, %25 : vector<16x4x32xf32>
    %cst_16 = arith.constant 0.000000e+00 : f32
    %27 = vector.broadcast %cst_16 : f32 to vector<16x4x32xf32>
    %28 = arith.maximumf %26, %27 : vector<16x4x32xf32>
    %cst_17 = arith.constant dense<0.000000e+00> : vector<16x32xf32>
    %29 = vector.multi_reduction <add>, %28, %cst_17 [1] : vector<16x4x32xf32> to vector<16x32xf32>
    %cst_18 = arith.constant 4.000000e+00 : f32
    %30 = vector.broadcast %cst_18 : f32 to vector<16x32xf32>
    %31 = arith.divf %29, %30 : vector<16x32xf32>
    %c0_19 = arith.constant 0 : index
    %c0_20 = arith.constant 0 : index
    %32 = vector.load %arg7[%c0_19, %c0_20] : memref<16x32xf32, #tpu.memory_space<vmem>>, vector<16x32xf32>
    tpu.vector_store %arg7[%c0_19, %c0_20], %31 {strides = array<i32>} : memref<16x32xf32, #tpu.memory_space<vmem>>, vector<16x32xf32>,
    return
  }
  func.func @transform_0(%arg0: i32) -> (i32, i32) {
    %c0_i32 = arith.constant 0 : i32
    %c0_i32_0 = arith.constant 0 : i32
    %c0_i32_1 = arith.constant 0 : i32
    return %c0_i32, %c0_i32_0 : i32, i32
  }
  func.func @transform_1(%arg0: i32) -> (i32, i32, i32) {
    %c0_i32 = arith.constant 0 : i32
    %c0_i32_0 = arith.constant 0 : i32
    %c0_i32_1 = arith.constant 0 : i32
    return %arg0, %c0_i32, %c0_i32_0 : i32, i32, i32
  }
  func.func @transform_2(%arg0: i32) -> (i32, i32) {
    %c0_i32 = arith.constant 0 : i32
    %c0_i32_0 = arith.constant 0 : i32
    %c0_i32_1 = arith.constant 0 : i32
    return %c0_i32, %c0_i32_0 : i32, i32
  }
  func.func @transform_3(%arg0: i32) -> (i32, i32) {
    %c0_i32 = arith.constant 0 : i32
    %c0_i32_0 = arith.constant 0 : i32
    %c0_i32_1 = arith.constant 0 : i32
    return %c0_i32, %c0_i32_0 : i32, i32
  }
  func.func @transform_4(%arg0: i32) -> (i32, i32) {
    %c0_i32 = arith.constant 0 : i32
    %c0_i32_0 = arith.constant 0 : i32
    %c0_i32_1 = arith.constant 0 : i32
    return %c0_i32, %c0_i32_0 : i32, i32
  }
  func.func @transform_5(%arg0: i32) -> (i32, i32) {
    %c0_i32 = arith.constant 0 : i32
    %c0_i32_0 = arith.constant 0 : i32
    %c0_i32_1 = arith.constant 0 : i32
    return %c0_i32, %c0_i32_0 : i32, i32
  }
  func.func @transform_6(%arg0: i32) -> (i32, i32) {
    %c0_i32 = arith.constant 0 : i32
    %c0_i32_0 = arith.constant 0 : i32
    return %arg0, %c0_i32 : i32, i32
  }
}

</mosaic_0001>

<bundles_post_ra>
// kernel: tpu_custom_call.1
= control target key start
LH: loop header
LB: loop body
LE: loop exit
PB: predicated region body
PF: predicated region fallthrough
CT: control target
= control target key end

     0   :  { %vm48_vm0 = vcmask 1043456   ;;  %v3310_v1 = vmov 0.0   ;;  %vm44_vm1 = vcmask 31744   ;;  %vm3311_vm2 = vmmov 0   ;;  %s3692_s0 = inlined_call_operand.vmem [shape: f32[4,4], index: 0, kind: input, shape index: {}]   ;;  %s3693_s1 = inlined_call_operand.vmem [shape: f32[16,4,4], index: 1, kind: input, shape index: {}]   ;;  %s3694_s2 = inlined_call_operand.vmem [shape: bf16[4,32], index: 2, kind: input, shape index: {}]   ;;  %s3695_s3 = inlined_call_operand.vmem [shape: f32[1,32], index: 3, kind: input, shape index: {}]   ;;  %s3696_s4 = inlined_call_operand.vmem [shape: bf16[32,32], index: 4, kind: input, shape index: {}]   ;;  %s3697_s5 = inlined_call_operand.vmem [shape: f32[1,32], index: 5, kind: input, shape index: {}]   ;;  %s3698_s6 = inlined_call_operand.hbm [shape: f32[16,32], index: 6, kind: output, shape index: {}]  }
   0x1   :  { %v25_v0 = vld [vmem:[%s3693_s1] sm:$0xf]  ;;  %3095 = vmatprep.subr.mxu0 %v3310_v1  ;;  %3100 = vmatprep.subr.mxu1 %v3310_v1  ;;  %v26_v2 = vld [vmem:[%s3693_s1 + $0x4] sm:$0xf]  ;;  %v27_v4 = vld [vmem:[%s3693_s1 + $0x8] sm:$0xf] }
   0x2   :  { %v3361_v3 = vld [vmem:[%s3692_s0] sm:$0xf]  ;;  %3096 = vmatpush3.msk.msra.mxu0 %vm48_vm0, %v25_v0  ;;  %3097 = vmatprep.mubr.msk.f32.mxu0 %vm3311_vm2, %v3310_v1  ;;  %v28_v5 = vld [vmem:[%s3693_s1 + $0xc] sm:$0xf]  ;;  %v29_v6 = vld [vmem:[%s3693_s1 + $0x10] sm:$0xf] }
   0x3   :  { %3101 = vmatpush3.msk.msra.mxu1 %vm48_vm0, %v26_v2  ;;  %3102 = vmatprep.mubr.msk.f32.mxu1 %vm3311_vm2, %v3310_v1 }
   0x4   :  { %3098 = vmatmul.mubr.msk.f32.vlgmr.msra.gmra.mxu0 %vm44_vm1, %v3361_v3  ;;  %3103 = vmatmul.mubr.msk.f32.vlgmr.msra.gmra.mxu1 %vm44_vm1, %v3361_v3 }
   0x5   :  { %3105 = vmatprep.subr.mxu0 %v3310_v1  ;;  %3110 = vmatprep.subr.mxu1 %v3310_v1 }
   0x6   :  { %3106 = vmatpush3.msk.msra.mxu0 %vm48_vm0, %v27_v4  ;;  %3107 = vmatprep.mubr.msk.f32.mxu0 %vm3311_vm2, %v3310_v1 }
   0x7   :  { %3111 = vmatpush3.msk.msra.mxu1 %vm48_vm0, %v28_v5  ;;  %3112 = vmatprep.mubr.msk.f32.mxu1 %vm3311_vm2, %v3310_v1 }
   0x8   :  { %11 = vsyncpa [#allocation3], 0  ;;  %3108 = vmatmul.mubr.msk.f32.vlgmr.msra.gmra.mxu0 %vm44_vm1, %v3361_v3  ;;  %3113 = vmatmul.mubr.msk.f32.vlgmr.msra.gmra.mxu1 %vm44_vm1, %v3361_v3  ;;  %v30_v7 = vld [vmem:[%s3693_s1 + $0x14] sm:$0xf]  ;;  %v31_v8 = vld [vmem:[%s3693_s1 + $0x18] sm:$0xf] }
   0x9   :  { %3115 = vmatprep.subr.mxu0 %v3310_v1  ;;  %3120 = vmatprep.subr.mxu1 %v3310_v1  ;;  %v32_v9 = vld [vmem:[%s3693_s1 + $0x1c] sm:$0xf]  ;;  %v33_v10 = vld [vmem:[%s3693_s1 + $0x20] sm:$0xf]  ;;  %v34_v11 = vld [vmem:[%s3693_s1 + $0x24] sm:$0xf] }
   0xa   :  { %3116 = vmatpush3.msk.msra.mxu0 %vm48_vm0, %v29_v6  ;;  %3117 = vmatprep.mubr.msk.f32.mxu0 %vm3311_vm2, %v3310_v1  ;;  %v35_v12 = vld [vmem:[%s3693_s1 + $0x28] sm:$0xf]  ;;  %v36_v13 = vld [vmem:[%s3693_s1 + $0x2c] sm:$0xf]  ;;  %v37_v14 = vld [vmem:[%s3693_s1 + $0x30] sm:$0xf] }
   0xb   :  { %3121 = vmatpush3.msk.msra.mxu1 %vm48_vm0, %v30_v7  ;;  %3122 = vmatprep.mubr.msk.f32.mxu1 %vm3311_vm2, %v3310_v1  ;;  %v38_v15 = vld [vmem:[%s3693_s1 + $0x34] sm:$0xf]  ;;  %v39_v16 = vld [vmem:[%s3693_s1 + $0x38] sm:$0xf]  ;;  %v40_v17 = vld [vmem:[%s3693_s1 + $0x3c] sm:$0xf] }
   0xc   :  { %3118 = vmatmul.mubr.msk.f32.vlgmr.msra.gmra.mxu0 %vm44_vm1, %v3361_v3  ;;  %3123 = vmatmul.mubr.msk.f32.vlgmr.msra.gmra.mxu1 %vm44_vm1, %v3361_v3  ;;  %v42_v18 = vld [vmem:[%s3694_s2] sm:$0x3]  ;;  %vm1265_vm3 = vcmask 1041408   ;;  %vm2617_vm4 = vcmask 261120   ;;  %vm2757_vm5 = vcmask 257024   ;;  %vm2903_vm6 = vcmask 1041409  }
   0xd   :  { %3125 = vmatprep.subr.mxu0 %v3310_v1  ;;  %3130 = vmatprep.subr.mxu1 %v3310_v1  ;;  %v1267_v19 = vsel %vm1265_vm3, %v42_v18, 0  ;;  %v3515_v0 = vld [vmem:[%s3695_s3] ss:$0 sm:$0xff]  ;;  %vm2905_vm7 = vcmask 1042434   ;;  %vm2907_vm8 = vcmask 1043459   ;;  %vm2909_vm9 = vcmask 1044484  }
   0xe   :  { %3126 = vmatpush3.msk.msra.mxu0 %vm48_vm0, %v31_v8  ;;  %3127 = vmatprep.mubr.msk.f32.mxu0 %vm3311_vm2, %v3310_v1  ;;  %vm2911_vm10 = vcmask 1045509   ;;  %vm2913_vm11 = vcmask 1046534   ;;  %vm2915_vm12 = vcmask 1047559  }
   0xf   :  { %3131 = vmatpush3.msk.msra.mxu1 %vm48_vm0, %v32_v9  ;;  %3132 = vmatprep.mubr.msk.f32.mxu1 %vm3311_vm2, %v3310_v1 }
  0x10   :  { %3128 = vmatmul.mubr.msk.f32.vlgmr.msra.gmra.mxu0 %vm44_vm1, %v3361_v3  ;;  %3133 = vmatmul.mubr.msk.f32.vlgmr.msra.gmra.mxu1 %vm44_vm1, %v3361_v3 }
  0x11   :  { %3135 = vmatprep.subr.mxu0 %v3310_v1  ;;  %3140 = vmatprep.subr.mxu1 %v3310_v1 }
  0x12   :  { %3136 = vmatpush3.msk.msra.mxu0 %vm48_vm0, %v33_v10  ;;  %3137 = vmatprep.mubr.msk.f32.mxu0 %vm3311_vm2, %v3310_v1 }
  0x13   :  { %3141 = vmatpush3.msk.msra.mxu1 %vm48_vm0, %v34_v11  ;;  %3142 = vmatprep.mubr.msk.f32.mxu1 %vm3311_vm2, %v3310_v1 }
  0x14   :  { %3138 = vmatmul.mubr.msk.f32.vlgmr.msra.gmra.mxu0 %vm44_vm1, %v3361_v3  ;;  %3143 = vmatmul.mubr.msk.f32.vlgmr.msra.gmra.mxu1 %vm44_vm1, %v3361_v3 }
  0x15   :  { %3145 = vmatprep.subr.mxu0 %v3310_v1  ;;  %3150 = vmatprep.subr.mxu1 %v3310_v1 }
  0x16   :  { %3146 = vmatpush3.msk.msra.mxu0 %vm48_vm0, %v35_v12  ;;  %3147 = vmatprep.mubr.msk.f32.mxu0 %vm3311_vm2, %v3310_v1 }
  0x17   :  { %3151 = vmatpush3.msk.msra.mxu1 %vm48_vm0, %v36_v13  ;;  %3152 = vmatprep.mubr.msk.f32.mxu1 %vm3311_vm2, %v3310_v1 }
  0x18   :  { %3148 = vmatmul.mubr.msk.f32.vlgmr.msra.gmra.mxu0 %vm44_vm1, %v3361_v3  ;;  %3153 = vmatmul.mubr.msk.f32.vlgmr.msra.gmra.mxu1 %vm44_vm1, %v3361_v3 }
  0x19   :  { %3155 = vmatprep.subr.mxu0 %v3310_v1  ;;  %3160 = vmatprep.subr.mxu1 %v3310_v1 }
  0x1a   :  { %3156 = vmatpush3.msk.msra.mxu0 %vm48_vm0, %v37_v14  ;;  %3157 = vmatprep.mubr.msk.f32.mxu0 %vm3311_vm2, %v3310_v1 }
  0x1b   :  { %3161 = vmatpush3.msk.msra.mxu1 %vm48_vm0, %v38_v15  ;;  %3162 = vmatprep.mubr.msk.f32.mxu1 %vm3311_vm2, %v3310_v1 }
  0x1c   :  { %3158 = vmatmul.mubr.msk.f32.vlgmr.msra.gmra.mxu0 %vm44_vm1, %v3361_v3  ;;  %3163 = vmatmul.mubr.msk.f32.vlgmr.msra.gmra.mxu1 %vm44_vm1, %v3361_v3 }
  0x1d   :  { %3165 = vmatprep.subr.mxu0 %v3310_v1  ;;  %3170 = vmatprep.subr.mxu1 %v3310_v1 }
  0x1e   :  { %3166 = vmatpush3.msk.msra.mxu0 %vm48_vm0, %v39_v16  ;;  %3167 = vmatprep.mubr.msk.f32.mxu0 %vm3311_vm2, %v3310_v1 }
  0x1f   :  { %3171 = vmatpush3.msk.msra.mxu1 %vm48_vm0, %v40_v17  ;;  %3172 = vmatprep.mubr.msk.f32.mxu1 %vm3311_vm2, %v3310_v1 }
  0x20   :  { %3168 = vmatmul.mubr.msk.f32.vlgmr.msra.gmra.mxu0 %vm44_vm1, %v3361_v3  ;;  %3173 = vmatmul.mubr.msk.f32.vlgmr.msra.gmra.mxu1 %vm44_vm1, %v3361_v3 }
  0x21   :  { %3279 = vmatprep.subr.msk.bf16.mxu0 %vm1265_vm3, %v42_v18  ;;  %3280 = vmatprep.subr.msk.bf16.mxu1 %vm1265_vm3, %v42_v18 }
  0x22   :  { %3176 = vmatpush3.bf16.msra.mxu0 %v1267_v19  ;;  %3278 = vmatpush3.bf16.msra.mxu1 %v1267_v19 }
  0x23   :  { %3205 = vmatprep.subr.mxu0 %v3310_v1  ;;  %3185 = vmatprep.subr.mxu1 %v3310_v1 }
  0xc4   :  { %v118_v20 = vpop.f32.mrf.mxu0  ;;  %v191_v21 = vpop.f32.mrf.mxu1 }
  0xc5   :  { %v1233_v26 = vcombine.low %v118_v20, %v191_v21 }
  0xc6   :  { %v3099_v22 = vpop.f32.mrf.mxu0  ;;  %v3104_v23 = vpop.f32.mrf.mxu1 }
  0xc8   :  { %v264_v24 = vpop.f32.mrf.mxu0  ;;  %v337_v25 = vpop.f32.mrf.mxu1 }
  0xc9   :  { %v1234_v27 = vcombine.low %v264_v24, %v337_v25 }
  0xca   :  { %v3109_v28 = vpop.f32.mrf.mxu0  ;;  %v3114_v29 = vpop.f32.mrf.mxu1 }
  0xcb   :  { %v1249_v30 = vpack.c.bf16 %v1234_v27, %v1233_v26 }
  0xcc   :  { %v410_v31 = vpop.f32.mrf.mxu0  ;;  %v483_v32 = vpop.f32.mrf.mxu1 }
  0xcd   :  { %3177 = vmatprep.mubr.msk.bf16.mxu0 %vm44_vm1, %v1249_v30  ;;  %v1235_v37 = vcombine.low %v410_v31, %v483_v32 }
  0xce   :  { %v3119_v33 = vpop.f32.mrf.mxu0  ;;  %v3124_v34 = vpop.f32.mrf.mxu1 }
  0xd0   :  { %v556_v35 = vpop.f32.mrf.mxu0  ;;  %v629_v36 = vpop.f32.mrf.mxu1 }
  0xd1   :  { %v1236_v38 = vcombine.low %v556_v35, %v629_v36 }
  0xd2   :  { %v3129_v39 = vpop.f32.mrf.mxu0  ;;  %v3134_v40 = vpop.f32.mrf.mxu1 }
  0xd3   :  { %v1250_v41 = vpack.c.bf16 %v1236_v38, %v1235_v37 }
  0xd4   :  { %v702_v42 = vpop.f32.mrf.mxu0  ;;  %v775_v43 = vpop.f32.mrf.mxu1 }
  0xd5   :  { %3178 = vmatmul.mubr.msk.bf16.vlgmr.msra.gmra.mxu0 %vm44_vm1, %v1250_v41  ;;  %v1237_v46 = vcombine.low %v702_v42, %v775_v43 }
  0xd6   :  { %v3139_v44 = vpop.f32.mrf.mxu0  ;;  %v3144_v45 = vpop.f32.mrf.mxu1  ;;  %3207 = vmatprep.mubr.msk.f32.mxu0 %vm3311_vm2, %v3310_v1 }
  0xd8   :  { %v848_v47 = vpop.f32.mrf.mxu0  ;;  %v921_v48 = vpop.f32.mrf.mxu1 }
  0xd9   :  { %v1238_v49 = vcombine.low %v848_v47, %v921_v48 }
  0xda   :  { %v3149_v50 = vpop.f32.mrf.mxu0  ;;  %v3154_v51 = vpop.f32.mrf.mxu1 }
  0xdb   :  { %v1251_v52 = vpack.c.bf16 %v1238_v49, %v1237_v46  ;;  %v3286_v51 = vld [vmem:[%s3696_s4 + $0x8] sm:$0xff]  }
  0xdc   :  { %v994_v53 = vpop.f32.mrf.mxu0  ;;  %v1067_v54 = vpop.f32.mrf.mxu1 }
  0xdd   :  { %3181 = vmatprep.mubr.msk.bf16.mxu1 %vm44_vm1, %v1251_v52  ;;  %v1239_v57 = vcombine.low %v994_v53, %v1067_v54  ;;  %v3287_v52 = vld [vmem:[%s3696_s4] sm:$0xff]  }
  0xde   :  { %v3159_v55 = vpop.f32.mrf.mxu0  ;;  %v3164_v56 = vpop.f32.mrf.mxu1 }
  0xe0   :  { %v1140_v58 = vpop.f32.mrf.mxu0  ;;  %v1213_v59 = vpop.f32.mrf.mxu1 }
  0xe1   :  { %v1240_v60 = vcombine.low %v1140_v58, %v1213_v59 }
  0xe2   :  { %v3169_v61 = vpop.f32.mrf.mxu0  ;;  %v3174_v62 = vpop.f32.mrf.mxu1 }
  0xe3   :  { %v1252_v63 = vpack.c.bf16 %v1240_v60, %v1239_v57 }
  0xe5   :  { %3182 = vmatmul.mubr.msk.bf16.vlgmr.msra.gmra.mxu1 %vm44_vm1, %v1252_v63 }
  0xe6   :  { %3187 = vmatprep.mubr.msk.f32.mxu1 %vm3311_vm2, %v3310_v1 }
 0x195   :  { %v3179_v2 = vpop.f32.mrf.mxu0 }
 0x196   :  { %v1368_v4 = vadd.f32 %v3179_v2, %v3515_v0  ;;  %v1344_v19 = vcombine.high %v3179_v2, %v3179_v2 }
 0x197   :  { %v1303_v5 = vpop.f32.mrf.mxu0 }
 0x198   :  { %v1384_v6 = vmax.f32 %v1368_v4, 0.0  ;;  %v1342_v7 = vcombine.high %v1303_v5, %v1303_v5  ;;  %v1364_v8 = vadd.f32 %v3515_v0, %v1303_v5  ;;  %v1369_v21 = vadd.f32 %v3515_v0, %v1344_v19 }
 0x199   :  { %v3180_v9 = vpop.f32.mrf.mxu0 }
 0x19a   :  { %v1365_v10 = vadd.f32 %v3515_v0, %v1342_v7  ;;  %v1380_v11 = vmax.f32 %v1364_v8, 0.0  ;;  %3206 = vmatpush3.msk.msra.mxu0 %vm48_vm0, %v1384_v6  ;;  %v1370_v12 = vadd.f32 %v3180_v9, %v3515_v0  ;;  %v1345_v22 = vcombine.high %v3180_v9, %v3180_v9 }
 0x19b   :  { %v1306_v13 = vpop.f32.mrf.mxu0  ;;  %3215 = vmatprep.subr.mxu0 %v3310_v1  ;;  %3208 = vmatmul.mubr.msk.f32.vlgmr.msra.gmra.mxu0 %vm44_vm1, %v3361_v3  ;;  %v1385_v26 = vmax.f32 %v1369_v21, 0.0 }
 0x19c   :  { %v1381_v14 = vmax.f32 %v1365_v10, 0.0  ;;  %v1343_v15 = vcombine.high %v1306_v13, %v1306_v13  ;;  %v1366_v16 = vadd.f32 %v3515_v0, %v1306_v13  ;;  %3186 = vmatpush3.msk.msra.mxu1 %vm48_vm0, %v1380_v11  ;;  %3217 = vmatprep.mubr.msk.f32.mxu0 %vm3311_vm2, %v3310_v1  ;;  %v1386_v17 = vmax.f32 %v1370_v12, 0.0 }
 0x19d   :  { %3188 = vmatmul.mubr.msk.f32.vlgmr.msra.gmra.mxu1 %vm44_vm1, %v3361_v3  ;;  %3190 = vmatprep.subr.mxu1 %v3310_v1  ;;  %v1371_v27 = vadd.f32 %v3515_v0, %v1345_v22 }
 0x19e   :  { %v1382_v18 = vmax.f32 %v1366_v16, 0.0  ;;  %3191 = vmatpush3.msk.msra.mxu1 %vm48_vm0, %v1381_v14  ;;  %3192 = vmatprep.mubr.msk.f32.mxu1 %vm3311_vm2, %v3310_v1  ;;  %v1367_v20 = vadd.f32 %v3515_v0, %v1343_v15 }
 0x19f   :  { %3216 = vmatpush3.msk.msra.mxu0 %vm48_vm0, %v1386_v17  ;;  %3195 = vmatprep.subr.mxu1 %v3310_v1  ;;  %v1387_v33 = vmax.f32 %v1371_v27, 0.0 }
 0x1a0   :  { %3218 = vmatmul.mubr.msk.f32.vlgmr.msra.gmra.mxu0 %vm44_vm1, %v3361_v3  ;;  %3225 = vmatprep.subr.mxu0 %v3310_v1  ;;  %v1383_v23 = vmax.f32 %v1367_v20, 0.0 }
 0x1a1   :  { %3193 = vmatmul.mubr.msk.f32.vlgmr.msra.gmra.mxu1 %vm44_vm1, %v3361_v3  ;;  %3227 = vmatprep.mubr.msk.f32.mxu0 %vm3311_vm2, %v3310_v1 }
 0x1a2   :  { %3196 = vmatpush3.msk.msra.mxu1 %vm48_vm0, %v1382_v18  ;;  %3197 = vmatprep.mubr.msk.f32.mxu1 %vm3311_vm2, %v3310_v1 }
 0x1a3   :  { %3200 = vmatprep.subr.mxu1 %v3310_v1 }
 0x1a5   :  { %v3183_v24 = vpop.f32.mrf.mxu1  ;;  %3198 = vmatmul.mubr.msk.f32.vlgmr.msra.gmra.mxu1 %vm44_vm1, %v3361_v3 }
 0x1a6   :  { %3201 = vmatpush3.msk.msra.mxu1 %vm48_vm0, %v1383_v23  ;;  %3202 = vmatprep.mubr.msk.f32.mxu1 %vm3311_vm2, %v3310_v1  ;;  %v1376_v37 = vadd.f32 %v3183_v24, %v3515_v0  ;;  %v1348_v39 = vcombine.high %v3183_v24, %v3183_v24 }
 0x1a7   :  { %v1319_v25 = vpop.f32.mrf.mxu1  ;;  %3210 = vmatprep.subr.mxu1 %v3310_v1 }
 0x1a8   :  { %v1346_v28 = vcombine.high %v1319_v25, %v1319_v25  ;;  %v1372_v29 = vadd.f32 %v3515_v0, %v1319_v25  ;;  %v1392_v42 = vmax.f32 %v1376_v37, 0.0  ;;  %v1377_v44 = vadd.f32 %v3515_v0, %v1348_v39 }
 0x1a9   :  { %v3184_v30 = vpop.f32.mrf.mxu1  ;;  %3203 = vmatmul.mubr.msk.f32.vlgmr.msra.gmra.mxu1 %vm44_vm1, %v3361_v3 }
 0x1aa   :  { %v1388_v31 = vmax.f32 %v1372_v29, 0.0  ;;  %3211 = vmatpush3.msk.msra.mxu1 %vm48_vm0, %v1385_v26  ;;  %3212 = vmatprep.mubr.msk.f32.mxu1 %vm3311_vm2, %v3310_v1  ;;  %v1373_v34 = vadd.f32 %v3515_v0, %v1346_v28  ;;  %v1378_v43 = vadd.f32 %v3184_v30, %v3515_v0  ;;  %v1349_v45 = vcombine.high %v3184_v30, %v3184_v30 }
 0x1ab   :  { %v1322_v32 = vpop.f32.mrf.mxu1  ;;  %3220 = vmatprep.subr.mxu1 %v3310_v1  ;;  %v1393_v48 = vmax.f32 %v1377_v44, 0.0 }
 0x1ac   :  { %v1347_v35 = vcombine.high %v1322_v32, %v1322_v32  ;;  %v1374_v36 = vadd.f32 %v3515_v0, %v1322_v32  ;;  %3226 = vmatpush3.msk.msra.mxu0 %vm48_vm0, %v1388_v31  ;;  %v1389_v40 = vmax.f32 %v1373_v34, 0.0  ;;  %v1394_v47 = vmax.f32 %v1378_v43, 0.0 }
 0x1ad   :  { %3213 = vmatmul.mubr.msk.f32.vlgmr.msra.gmra.mxu1 %vm44_vm1, %v3361_v3  ;;  %3228 = vmatmul.mubr.msk.f32.vlgmr.msra.gmra.mxu0 %vm44_vm1, %v3361_v3  ;;  %v1379_v49 = vadd.f32 %v3515_v0, %v1349_v45 }
 0x1ae   :  { %v1390_v38 = vmax.f32 %v1374_v36, 0.0  ;;  %3221 = vmatpush3.msk.msra.mxu1 %vm48_vm0, %v1387_v33  ;;  %3235 = vmatprep.subr.mxu0 %v3310_v1  ;;  %v1375_v41 = vadd.f32 %v3515_v0, %v1347_v35  ;;  %v3636_v33 = vld [vmem:[%s3697_s5] ss:$0 sm:$0xff]  ;;  %s3312_s5 = smov [#allocation2]  }
 0x1af   :  { %3222 = vmatprep.mubr.msk.f32.mxu1 %vm3311_vm2, %v3310_v1  ;;  %3237 = vmatprep.mubr.msk.f32.mxu0 %vm3311_vm2, %v3310_v1  ;;  %v1395_v50 = vmax.f32 %v1379_v49, 0.0  ;;  %s2933_s11 = sshll.u32 %s3312_s5, 4  ;;  %s2934_s11 = int_to_ptr.vmem [resolvable:$true] %s2933_s11 }
 0x1b0   :  { %3236 = vmatpush3.msk.msra.mxu0 %vm48_vm0, %v1390_v38  ;;  %3230 = vmatprep.subr.mxu1 %v3310_v1  ;;  %v1391_v46 = vmax.f32 %v1375_v41, 0.0  ;;  %s3288_s12 = scalar_lea.vmem %s2934_s11, 256  ;;  %p3293_p1 = scmp.lt.s32.totalorder %s2934_s11, %s2934_s11 }
 0x1b1   :  { %3223 = vmatmul.mubr.msk.f32.vlgmr.msra.gmra.mxu1 %vm44_vm1, %v3361_v3  ;;  %3238 = vmatmul.mubr.msk.f32.vlgmr.msra.gmra.mxu0 %vm44_vm1, %v3361_v3  ;;  %p3289_p0 = scmp.ne.s32.totalorder %s2934_s11, %s3288_s12  ;;  %p3294_p2 = scmp.lt.s32.totalorder %s3288_s12, %s3288_s12 }
 0x1b2   :  { %3245 = vmatprep.subr.mxu0 %v3310_v1  ;;  %3231 = vmatpush3.msk.msra.mxu1 %vm48_vm0, %v1389_v40 }
 0x1b3   :  { %3246 = vmatpush3.msk.msra.mxu0 %vm48_vm0, %v1392_v42  ;;  %3232 = vmatprep.mubr.msk.f32.mxu1 %vm3311_vm2, %v3310_v1  ;;  %p3295_p3 = por %p3294_p2, %p3293_p1 }
 0x1b4   :  { %3240 = vmatprep.subr.mxu1 %v3310_v1  ;;  %3247 = vmatprep.mubr.msk.f32.mxu0 %vm3311_vm2, %v3310_v1 }
 0x1b5   :  { %3255 = vmatprep.subr.mxu0 %v3310_v1  ;;  %3233 = vmatmul.mubr.msk.f32.vlgmr.msra.gmra.mxu1 %vm44_vm1, %v3361_v3  ;;  %p3296_p4 = pnand %p3295_p3, %p3289_p0 }
 0x1b6   :  { %3241 = vmatpush3.msk.msra.mxu1 %vm48_vm0, %v1391_v46  ;;  %3248 = vmatmul.mubr.msk.f32.vlgmr.msra.gmra.mxu0 %vm44_vm1, %v3361_v3 }
 0x1b7   :  { %3256 = vmatpush3.msk.msra.mxu0 %vm48_vm0, %v1394_v47  ;;  %3242 = vmatprep.mubr.msk.f32.mxu1 %vm3311_vm2, %v3310_v1 }
 0x1b8   :  { %3250 = vmatprep.subr.mxu1 %v3310_v1  ;;  %3257 = vmatprep.mubr.msk.f32.mxu0 %vm3311_vm2, %v3310_v1 }
 0x1b9   :  { %3243 = vmatmul.mubr.msk.f32.vlgmr.msra.gmra.mxu1 %vm44_vm1, %v3361_v3  ;;  %3265 = vmatprep.subr.bf16.mxu0 %v3286_v51 }
 0x1ba   :  { %3251 = vmatpush3.msk.msra.mxu1 %vm48_vm0, %v1393_v48  ;;  %3252 = vmatprep.mubr.msk.f32.mxu1 %vm3311_vm2, %v3310_v1 }
 0x1bb   :  { %3260 = vmatprep.subr.mxu1 %v3310_v1  ;;  %3258 = vmatmul.mubr.msk.f32.vlgmr.msra.gmra.mxu0 %vm44_vm1, %v3361_v3 }
 0x1bc   :  { %3266 = vmatpush3.bf16.msra.mxu0 %v3286_v51 }
 0x1bd   :  { %3253 = vmatmul.mubr.msk.f32.vlgmr.msra.gmra.mxu1 %vm44_vm1, %v3361_v3  ;;  %3267 = vmatprep.subr.bf16.mxu0 %v3287_v52 }
 0x1be   :  { %3261 = vmatpush3.msk.msra.mxu1 %vm48_vm0, %v1395_v50  ;;  %3262 = vmatprep.mubr.msk.f32.mxu1 %vm3311_vm2, %v3310_v1 }
 0x1c0   :  { %3268 = vmatpush3.bf16.msra.mxu0 %v3287_v52 }
 0x1c1   :  { %3263 = vmatmul.mubr.msk.f32.vlgmr.msra.gmra.mxu1 %vm44_vm1, %v3361_v3 }
 0x25b   :  { %v1762_v53 = vpop.f32.mrf.mxu0 }
 0x25d   :  { %v1470_v54 = vpop.f32.mrf.mxu1  ;;  %v3209_v55 = vpop.f32.mrf.mxu0 }
 0x25f   :  { %v3189_v56 = vpop.f32.mrf.mxu1 }
 0x260   :  { %v1908_v1 = vpop.f32.mrf.mxu0 }
 0x261   :  { %v1543_v57 = vpop.f32.mrf.mxu1 }
 0x262   :  { %v3219_v58 = vpop.f32.mrf.mxu0  ;;  %v2585_v62 = vcombine.low %v1470_v54, %v1543_v57 }
 0x263   :  { %v3194_v3 = vpop.f32.mrf.mxu1 }
 0x265   :  { %v1616_v59 = vpop.f32.mrf.mxu1 }
 0x267   :  { %v3199_v60 = vpop.f32.mrf.mxu1 }
 0x269   :  { %v1689_v61 = vpop.f32.mrf.mxu1 }
 0x26a   :  { %v2586_v63 = vcombine.low %v1616_v59, %v1689_v61 }
 0x26b   :  { %v3204_v0 = vpop.f32.mrf.mxu1 }
 0x26c   :  { %v2601_v2 = vpack.c.bf16 %v2586_v63, %v2585_v62 }
 0x26d   :  { %v1835_v4 = vpop.f32.mrf.mxu1  ;;  %v2054_v5 = vpop.f32.mrf.mxu0 }
 0x26e   :  { %3269 = vmatprep.mubr.msk.bf16.mxu0 %vm2617_vm4, %v2601_v2  ;;  %v2587_v10 = vcombine.low %v1762_v53, %v1835_v4 }
 0x26f   :  { %v3214_v6 = vpop.f32.mrf.mxu1  ;;  %v3229_v7 = vpop.f32.mrf.mxu0 }
 0x271   :  { %v1981_v8 = vpop.f32.mrf.mxu1  ;;  %v2200_v9 = vpop.f32.mrf.mxu0 }
 0x272   :  { %v2588_v11 = vcombine.low %v1908_v1, %v1981_v8 }
 0x273   :  { %v3224_v12 = vpop.f32.mrf.mxu1  ;;  %v3239_v13 = vpop.f32.mrf.mxu0 }
 0x274   :  { %v2602_v14 = vpack.c.bf16 %v2588_v11, %v2587_v10 }
 0x275   :  { %v2127_v15 = vpop.f32.mrf.mxu1 }
 0x276   :  { %3270 = vmatmul.mubr.msk.bf16.vlgmr.msra.gmra.mxu0 %vm2617_vm4, %v2602_v14  ;;  %v2346_v16 = vpop.f32.mrf.mxu0  ;;  %v2589_v20 = vcombine.low %v2054_v5, %v2127_v15 }
 0x277   :  { %v3234_v17 = vpop.f32.mrf.mxu1 }
 0x278   :  { %v3249_v18 = vpop.f32.mrf.mxu0 }
 0x279   :  { %v2273_v19 = vpop.f32.mrf.mxu1 }
 0x27a   :  { %v2590_v21 = vcombine.low %v2200_v9, %v2273_v19 }
 0x27b   :  { %v3244_v22 = vpop.f32.mrf.mxu1  ;;  %v2492_v23 = vpop.f32.mrf.mxu0 }
 0x27c   :  { %v2603_v24 = vpack.c.bf16 %v2590_v21, %v2589_v20 }
 0x27d   :  { %v2419_v25 = vpop.f32.mrf.mxu1  ;;  %v3259_v26 = vpop.f32.mrf.mxu0 }
 0x27e   :  { %3273 = vmatprep.mubr.msk.bf16.mxu0 %vm2617_vm4, %v2603_v24  ;;  %v2591_v29 = vcombine.low %v2346_v16, %v2419_v25 }
 0x27f   :  { %v3254_v27 = vpop.f32.mrf.mxu1 }
 0x281   :  { %v2565_v28 = vpop.f32.mrf.mxu1 }
 0x282   :  { %v2592_v30 = vcombine.low %v2492_v23, %v2565_v28 }
 0x283   :  { %v3264_v31 = vpop.f32.mrf.mxu1 }
 0x284   :  { %v2604_v32 = vpack.c.bf16 %v2592_v30, %v2591_v29 }
 0x286   :  { %3274 = vmatmul.mubr.msk.bf16.gmra.mxu0 %vm2617_vm4, %v2604_v32 }
 0x336   :  { %v3271_v34 = vpop.f32.mrf.mxu0 }
 0x337   :  { %v2705_v35 = vcombine.high %v3271_v34, %v3271_v34  ;;  %v2729_v36 = vadd.f32 %v3271_v34, %v3636_v33 }
 0x338   :  { %v2664_v37 = vpop.f32.mrf.mxu0 }
 0x339   :  { %v2730_v38 = vadd.f32 %v3636_v33, %v2705_v35  ;;  %v2745_v39 = vmax.f32 %v2729_v36, 0.0  ;;  %v2703_v40 = vcombine.high %v2664_v37, %v2664_v37  ;;  %v2725_v41 = vadd.f32 %v3636_v33, %v2664_v37 }
 0x33a   :  { %v3272_v42 = vpop.f32.mrf.mxu0 }
 0x33b   :  { %v2746_v43 = vmax.f32 %v2730_v38, 0.0  ;;  %v2786_v44 = vsel %vm2757_vm5, %v2745_v39, 0.0  ;;  %v2726_v45 = vadd.f32 %v3636_v33, %v2703_v40  ;;  %v2741_v46 = vmax.f32 %v2725_v41, 0.0 }
 0x33c   :  { %v2787_v47 = vrot.slane %v2786_v44, 4  ;;  %v2706_v48 = vcombine.high %v3272_v42, %v3272_v42  ;;  %v2731_v49 = vadd.f32 %v3272_v42, %v3636_v33  ;;  %v2667_v50 = vpop.f32.mrf.mxu0 }
 0x33d   :  { %v2793_v51 = vsel %vm2757_vm5, %v2746_v43, 0.0  ;;  %v2742_v52 = vmax.f32 %v2726_v45, 0.0  ;;  %v2758_v53 = vsel %vm2757_vm5, %v2741_v46, 0.0  ;;  %v2704_v54 = vcombine.high %v2667_v50, %v2667_v50 }
 0x33e   :  { %v2788_v55 = vadd.f32 %v2787_v47, %v2786_v44  ;;  %v2794_v56 = vrot.slane %v2793_v51, 4  ;;  %v2759_v1 = vrot.slane %v2758_v53, 4  ;;  %v2732_v57 = vadd.f32 %v3636_v33, %v2706_v48 }
 0x33f   :  { %v2765_v58 = vsel %vm2757_vm5, %v2742_v52, 0.0  ;;  %v2747_v3 = vmax.f32 %v2731_v49, 0.0  ;;  %v2727_v59 = vadd.f32 %v3636_v33, %v2667_v50  ;;  %v2728_v60 = vadd.f32 %v3636_v33, %v2704_v54 }
 0x340   :  { %v2795_v61 = vadd.f32 %v2794_v56, %v2793_v51  ;;  %v2760_v62 = vadd.f32 %v2759_v1, %v2758_v53  ;;  %v2766_v63 = vrot.slane %v2765_v58, 4  ;;  %v2748_v0 = vmax.f32 %v2732_v57, 0.0 }
 0x341   :  { %v2800_v2 = vsel %vm2757_vm5, %v2747_v3, 0.0  ;;  %v2743_v4 = vmax.f32 %v2727_v59, 0.0  ;;  %v2744_v5 = vmax.f32 %v2728_v60, 0.0  ;;  %v2789_v6 = vrot.slane %v2788_v55, 2 }
 0x342   :  { %v2761_v7 = vrot.slane %v2760_v62, 2  ;;  %v2767_v8 = vadd.f32 %v2766_v63, %v2765_v58  ;;  %v2801_v9 = vrot.slane %v2800_v2, 4  ;;  %v2807_v10 = vsel %vm2757_vm5, %v2748_v0, 0.0 }
 0x343   :  { %v2772_v11 = vsel %vm2757_vm5, %v2743_v4, 0.0  ;;  %v2779_v12 = vsel %vm2757_vm5, %v2744_v5, 0.0  ;;  %v2796_v13 = vrot.slane %v2795_v61, 2  ;;  %v2808_v17 = vrot.slane %v2807_v10, 4 }
 0x344   :  { %v2762_v14 = vadd.f32 %v2761_v7, %v2760_v62  ;;  %v2768_v15 = vrot.slane %v2767_v8, 2  ;;  %v2802_v16 = vadd.f32 %v2801_v9, %v2800_v2  ;;  %v2773_v18 = vrot.slane %v2772_v11, 4 }
 0x345   :  { %v2780_v19 = vrot.slane %v2779_v12, 4  ;;  %v2790_v22 = vadd.f32 %v2789_v6, %v2788_v55  ;;  %v2809_v23 = vadd.f32 %v2808_v17, %v2807_v10  ;;  %v2797_v26 = vadd.f32 %v2796_v13, %v2795_v61 }
 0x346   :  { %v2769_v20 = vadd.f32 %v2768_v15, %v2767_v8  ;;  %v3275_v21 = vpop.f32.mrf.mxu0  ;;  %v2774_v24 = vadd.f32 %v2773_v18, %v2772_v11  ;;  %v2763_v27 = vrot.slane %v2762_v14, 1  ;;  %v2803_v29 = vrot.slane %v2802_v16, 2 }
 0x347   :  { %v2781_v25 = vadd.f32 %v2780_v19, %v2779_v12  ;;  %v2709_v34 = vcombine.high %v3275_v21, %v3275_v21  ;;  %v2791_v35 = vrot.slane %v2790_v22, 1  ;;  %v2810_v36 = vrot.slane %v2809_v23, 2 }
 0x348   :  { %v2770_v28 = vrot.slane %v2769_v20, 1  ;;  %v2775_v30 = vrot.slane %v2774_v24, 2  ;;  %v2680_v32 = vpop.f32.mrf.mxu0  ;;  %v2798_v39 = vrot.slane %v2797_v26, 1  ;;  %v2737_v40 = vadd.f32 %v3275_v21, %v3636_v33 }
 0x349   :  { %v2782_v31 = vrot.slane %v2781_v25, 2  ;;  %v2738_v41 = vadd.f32 %v3636_v33, %v2709_v34  ;;  %v2707_v42 = vcombine.high %v2680_v32, %v2680_v32  ;;  %v2764_v43 = vadd.f32 %v2763_v27, %v2762_v14 }
 0x34a   :  { %v2776_v37 = vadd.f32 %v2775_v30, %v2774_v24  ;;  %v2771_v44 = vadd.f32 %v2770_v28, %v2769_v20  ;;  %v2804_v45 = vadd.f32 %v2803_v29, %v2802_v16  ;;  %v2753_v47 = vmax.f32 %v2737_v40, 0.0  ;;  %v3276_v53 = vpop.f32.mrf.mxu0 }
 0x34b   :  { %v2783_v38 = vadd.f32 %v2782_v31, %v2781_v25  ;;  %v2754_v48 = vmax.f32 %v2738_v41, 0.0  ;;  %v2733_v49 = vadd.f32 %v3636_v33, %v2680_v32  ;;  %v3657_v50 = vadd.f32 %v2791_v35, %v2790_v22 }
 0x34c   :  { %v2777_v46 = vrot.slane %v2776_v37, 1  ;;  %v2811_v51 = vadd.f32 %v2810_v36, %v2809_v23  ;;  %v2799_v54 = vadd.f32 %v2798_v39, %v2797_v26  ;;  %v2734_v56 = vadd.f32 %v3636_v33, %v2707_v42  ;;  %v2683_v6 = vpop.f32.mrf.mxu0 }
 0x34d   :  { %v2784_v52 = vrot.slane %v2783_v38, 1  ;;  %v2749_v1 = vmax.f32 %v2733_v49, 0.0  ;;  %v2871_v57 = vmul.f32 0.25, %v2764_v43  ;;  %v2872_v58 = vmul.f32 0.25, %v2771_v44 }
 0x34e   :  { %v2778_v55 = vadd.f32 %v2777_v46, %v2776_v37  ;;  %v2805_v3 = vrot.slane %v2804_v45, 1  ;;  %v2842_v59 = vsel %vm2757_vm5, %v2753_v47, 0.0  ;;  %v2849_v60 = vsel %vm2757_vm5, %v2754_v48, 0.0 }
 0x34f   :  { %v2750_v61 = vmax.f32 %v2734_v56, 0.0  ;;  %v2814_v62 = vsel %vm2757_vm5, %v2749_v1, 0.0  ;;  %v2710_v63 = vcombine.high %v3276_v53, %v3276_v53  ;;  %v2812_v0 = vrot.slane %v2811_v51, 1 }
 0x350   :  { %v2785_v2 = vadd.f32 %v2784_v52, %v2783_v38  ;;  %v2815_v4 = vrot.slane %v2814_v62, 4  ;;  %v2739_v5 = vadd.f32 %v3276_v53, %v3636_v33  ;;  %v2873_v7 = vmul.f32 0.25, %v2778_v55 }
 0x351   :  { %v2843_v8 = vrot.slane %v2842_v59, 4  ;;  %v2821_v9 = vsel %vm2757_vm5, %v2750_v61, 0.0  ;;  %v2740_v10 = vadd.f32 %v3636_v33, %v2710_v63  ;;  %v2850_v11 = vrot.slane %v2849_v60, 4 }
 0x352   :  { %v2816_v12 = vadd.f32 %v2815_v4, %v2814_v62  ;;  %v2822_v13 = vrot.slane %v2821_v9, 4  ;;  %v2755_v14 = vmax.f32 %v2739_v5, 0.0  ;;  %v2904_v15 = vsel %vm2903_vm6, %v2872_v58, %v2871_v57 }
 0x353   :  { %v2756_v16 = vmax.f32 %v2740_v10, 0.0  ;;  %v2708_v17 = vcombine.high %v2683_v6, %v2683_v6  ;;  %v2735_v18 = vadd.f32 %v3636_v33, %v2683_v6  ;;  %v2874_v19 = vmul.f32 0.25, %v2785_v2 }
 0x354   :  { %v2817_v20 = vrot.slane %v2816_v12, 2  ;;  %v2823_v21 = vadd.f32 %v2822_v13, %v2821_v9  ;;  %v2856_v22 = vsel %vm2757_vm5, %v2755_v14, 0.0  ;;  %v2844_v23 = vadd.f32 %v2843_v8, %v2842_v59 }
 0x355   :  { %v2857_v24 = vrot.slane %v2856_v22, 4  ;;  %v2863_v25 = vsel %vm2757_vm5, %v2756_v16, 0.0  ;;  %v2736_v26 = vadd.f32 %v3636_v33, %v2708_v17  ;;  %v2906_v27 = vsel %vm2905_vm7, %v2873_v7, %v2904_v15 }
 0x356   :  { %v2851_v28 = vadd.f32 %v2850_v11, %v2849_v60  ;;  %v2824_v29 = vrot.slane %v2823_v21, 2  ;;  %v2864_v30 = vrot.slane %v2863_v25, 4  ;;  %v2806_v31 = vadd.f32 %v2805_v3, %v2804_v45 }
 0x357   :  { %v2858_v32 = vadd.f32 %v2857_v24, %v2856_v22  ;;  %v2751_v34 = vmax.f32 %v2735_v18, 0.0  ;;  %v2752_v35 = vmax.f32 %v2736_v26, 0.0  ;;  %v2813_v36 = vadd.f32 %v2812_v0, %v2811_v51 }
 0x358   :  { %v2818_v37 = vadd.f32 %v2817_v20, %v2816_v12  ;;  %v2825_v38 = vadd.f32 %v2824_v29, %v2823_v21  ;;  %v2865_v39 = vadd.f32 %v2864_v30, %v2863_v25  ;;  %v2908_v40 = vsel %vm2907_vm8, %v2874_v19, %v2906_v27 }
 0x359   :  { %v2845_v41 = vrot.slane %v2844_v23, 2  ;;  %v2828_v42 = vsel %vm2757_vm5, %v2751_v34, 0.0  ;;  %v2835_v33 = vsel %vm2757_vm5, %v2752_v35, 0.0  ;;  %v2875_v43 = vmul.f32 0.25, %v3657_v50 }
 0x35a   :  { %v2876_v44 = vmul.f32 0.25, %v2799_v54  ;;  %v2852_v46 = vrot.slane %v2851_v28, 2  ;;  %v2826_v47 = vrot.slane %v2825_v38, 1  ;;  %v2877_v45 = vmul.f32 0.25, %v2806_v31 }
 0x35b   :  { %v2859_v48 = vrot.slane %v2858_v32, 2  ;;  %v2829_v49 = vrot.slane %v2828_v42, 4  ;;  %v2836_v52 = vrot.slane %v2835_v33, 4  ;;  %v2878_v51 = vmul.f32 0.25, %v2813_v36 }
 0x35c   :  { %v2819_v53 = vrot.slane %v2818_v37, 1  ;;  %v2866_v55 = vrot.slane %v2865_v39, 2  ;;  %v2910_v56 = vsel %vm2909_vm9, %v2875_v43, %v2908_v40  ;;  %v2846_v1 = vadd.f32 %v2845_v41, %v2844_v23 }
 0x35d   :  { %v2830_v57 = vadd.f32 %v2829_v49, %v2828_v42  ;;  %v2837_v58 = vadd.f32 %v2836_v52, %v2835_v33  ;;  %v2912_v3 = vsel %vm2911_vm10, %v2876_v44, %v2910_v56  ;;  %v2853_v59 = vadd.f32 %v2852_v46, %v2851_v28 }
 0x35e   :  { %v2827_v60 = vadd.f32 %v2826_v47, %v2825_v38  ;;  %v2914_v50 = vsel %vm2913_vm11, %v2877_v45, %v2912_v3  ;;  %v2860_v54 = vadd.f32 %v2859_v48, %v2858_v32  ;;  %v2820_v0 = vadd.f32 %v2819_v53, %v2818_v37 }
 0x35f   :  { %v2831_v61 = vrot.slane %v2830_v57, 2  ;;  %v2838_v62 = vrot.slane %v2837_v58, 2  ;;  %v2916_v63 = vsel %vm2915_vm12, %v2878_v51, %v2914_v50  ;;  %v2867_v2 = vadd.f32 %v2866_v55, %v2865_v39 }
 0x360   :  { %2926 = vst.msk [vmem:[#allocation2] sm:$0xff] %vm2617_vm4, %v2916_v63  ;;  %v2847_v4 = vrot.slane %v2846_v1, 1  ;;  %v2854_v7 = vrot.slane %v2853_v59, 1  ;;  %v2880_v8 = vmul.f32 0.25, %v2827_v60  ;;  %v2861_v9 = vrot.slane %v2860_v54, 1 }
 0x361   :  { %v2832_v5 = vadd.f32 %v2831_v61, %v2830_v57  ;;  %v2839_v6 = vadd.f32 %v2838_v62, %v2837_v58  ;;  %v2879_v12 = vmul.f32 0.25, %v2820_v0  ;;  %v2868_v13 = vrot.slane %v2867_v2, 1 }
 0x362   :  { %v2848_v14 = vadd.f32 %v2847_v4, %v2846_v1  ;;  %v2855_v17 = vadd.f32 %v2854_v7, %v2853_v59  ;;  %v2862_v19 = vadd.f32 %v2861_v9, %v2860_v54 }
 0x363   :  { %v2833_v10 = vrot.slane %v2832_v5, 1  ;;  %v2840_v11 = vrot.slane %v2839_v6, 1  ;;  %v2917_v18 = vsel %vm2903_vm6, %v2880_v8, %v2879_v12  ;;  %v2869_v22 = vadd.f32 %v2868_v13, %v2867_v2 }
 0x364   :  { %v2883_v23 = vmul.f32 0.25, %v2848_v14  ;;  %v2884_v25 = vmul.f32 0.25, %v2855_v17  ;;  %v2885_v27 = vmul.f32 0.25, %v2862_v19 }
 0x365   :  { %v2834_v15 = vadd.f32 %v2833_v10, %v2832_v5  ;;  %v2841_v16 = vadd.f32 %v2840_v11, %v2839_v6  ;;  %v2886_v29 = vmul.f32 0.25, %v2869_v22 }
 0x367   :  { %v2881_v20 = vmul.f32 0.25, %v2834_v15  ;;  %v2882_v21 = vmul.f32 0.25, %v2841_v16 }
 0x369   :  { %v2918_v24 = vsel %vm2905_vm7, %v2881_v20, %v2917_v18 }
 0x36a   :  { %v2919_v26 = vsel %vm2907_vm8, %v2882_v21, %v2918_v24 }
 0x36b   :  { %v2920_v28 = vsel %vm2909_vm9, %v2883_v23, %v2919_v26 }
 0x36c   :  { %v2921_v30 = vsel %vm2911_vm10, %v2884_v25, %v2920_v28 }
 0x36d   :  { %v2922_v31 = vsel %vm2913_vm11, %v2885_v27, %v2921_v30 }
 0x36e   :  { %v2923_v32 = vsel %vm2915_vm12, %v2886_v29, %v2922_v31 }
 0x36f   :  { %2927 = vst.msk [vmem:[#allocation2 + $0x8] sm:$0xff] %vm2617_vm4, %v2923_v32 }
 0x370   :  { %3299 = shalt.err (!%p3296_p4)
}
 0x371   :  { %s3313_s13 = smov 128   ;;  %s3314_s14 = smov 8  }
 0x372   :  { %2939 = dma.vmem_to_hbm [thread:$0]  %s2934_s11, 256, %s3698_s6, [#allocation3], %s3313_s13, %s3313_s13, %s3314_s14  }
 0x373   :  { %3308 = dma.done.wait [#allocation3], 256  }
 0x374   :  { %3309 = vsyncadd [#allocation3], 4294967040 }
 0x375   :  { %2943 = vsyncpa [#allocation3], 1 }

</bundles_post_ra>
